<compile_context>
chip_gen: v5e
topology: v5e:2x2
jax: 0.10.0
libtpu: 0.0.40
codegen_flags: <defaults>
</compile_context>

<pallas_src>
import functools
import math

import jax
import jax.numpy as jnp
from jax.experimental import pallas as pl
from jax.experimental.pallas import tpu as pltpu

_LANE = 128
_BLOCK_BUDGET = 8 * 1024 * 1024    # target bytes per input block (double-buffered)
_STRIPE_BUDGET = 4 * 1024 * 1024   # target bytes per minimal-height column stripe
_VMEM_LIMIT = 48 * 1024 * 1024     # 2x block + scratch + mask, < v7x 64 MiB VMEM


def _tv_x_kernel(x_ref, mask_ref, out_ref, acc_ref, *, scale):
    """x_ref:   (rblk, cblk) native-dtype tile of the (N*C, H*W) slab.
    mask_ref:   (1, cblk) f32; 0 where the (col, col+1) pair is invalid.
    out_ref:    (1, 1, 128) f32 per-row-chunk output block.
    acc_ref:    (8, cblk) f32 scratch accumulator (vreg-wise partial sums)."""
    i = pl.program_id(1)
    j = pl.program_id(2)

    @pl.when((i == 0) & (j == 0))
    def _init():
        acc_ref[...] = jnp.zeros_like(acc_ref)

    xf = x_ref[...].astype(jnp.float32)            # in-kernel upcast (free vs DMA)
    rblk, cblk = xf.shape
    nxt = pltpu.roll(xf, shift=cblk - 1, axis=1)   # nxt[:, c] = xf[:, (c + 1) % cblk]
    d = (nxt - xf) * mask_ref[...]                 # mask kills row-boundary & wrap pairs
    sq = d * d
    # Fold sublane-groups with pure vreg-wise VPU adds (layout-preserving reshape);
    # no cross-lane reduce and no (1,1) masked store inside the streaming loop.
    acc_ref[...] += jnp.sum(sq.reshape(rblk // 8, 8, cblk), axis=0)

    @pl.when((i == pl.num_programs(1) - 1) & (j == pl.num_programs(2) - 1))
    def _finalize():
        tot = jnp.sum(acc_ref[...], keepdims=True) * scale          # (1, 1)
        out_ref[...] = jnp.broadcast_to(tot.reshape(1, 1, 1), out_ref.shape)


def _pick_col_block(cols, w, itemsize):
    """Column tile: divides cols and is a multiple of both 128 and W (so the
    pair mask also zeroes tile seams / the roll wrap); full width if small or
    no clean tiling exists."""
    if cols * 8 * itemsize <= _STRIPE_BUDGET:
        return cols
    step = (_LANE * w) // math.gcd(_LANE, w)
    if cols % step != 0:
        return cols                                # fall back to full width
    max_c = max(step, _STRIPE_BUDGET // (8 * itemsize))
    best = step
    for cand in range(step, min(cols, max_c) + 1, step):
        if cols % cand == 0:
            best = cand
    return best


def _pick_row_block(rows_p, cblk, sub, itemsize):
    """Largest multiple of the sublane granule dividing rows_p with block bytes
    under ~_BLOCK_BUDGET (rows_p is always a multiple of `sub`)."""
    max_r = max(sub, _BLOCK_BUDGET // (cblk * itemsize))
    if rows_p <= max_r:
        return rows_p
    best = sub
    for cand in range(sub, min(rows_p, max_r) + 1, sub):
        if rows_p % cand == 0:
            best = cand
    return best


@functools.partial(jax.jit, static_argnames=("weight",))
def tv_x_loss_pallas(x, weight=1.0):
    """x: (N, C, H, W) array -> scalar float32, matching TV_x_Loss.forward."""
    n, c, h, w = x.shape
    assert w >= 2, "TV_x_Loss needs W >= 2"

    rows, cols = n * c, h * w
    itemsize = jnp.dtype(x.dtype).itemsize
    sub = max(8, 32 // itemsize)                   # sublane granule: f32 8, bf16 16, i8 32

    x2 = x.reshape(rows, cols)                     # free reshape of contiguous NCHW
    rows_p = ((rows + sub - 1) // sub) * sub
    if rows_p != rows:                             # zero rows contribute 0 to the sum
        x2 = jnp.pad(x2, ((0, rows_p - rows), (0, 0)))

    # 0/1 mask over global columns: pair (col, col+1) is valid iff col % W != W-1.
    col = jnp.arange(cols, dtype=jnp.int32)
    mask = (col % w != (w - 1)).astype(jnp.float32).reshape(1, cols)

    count_w = c * h * (w - 1)
    scale = float(weight) * 2.0 / float(count_w) / float(n)   # h_tv term is identically 0

    cblk = _pick_col_block(cols, w, itemsize)
    rblk = _pick_row_block(rows_p, cblk, sub, itemsize)
    nrb, ncb = rows_p // rblk, cols // cblk
    nchunk = 2 if nrb % 2 == 0 else 1              # row super-chunks (v7x: one per TC)
    rpc = nrb // nchunk                            # row-blocks per chunk

    out = pl.pallas_call(
        functools.partial(_tv_x_kernel, scale=scale),
        out_shape=jax.ShapeDtypeStruct((nchunk, 1, _LANE), jnp.float32),
        grid_spec=pltpu.PrefetchScalarGridSpec(
            num_scalar_prefetch=0,
            grid=(nchunk, rpc, ncb),
            in_specs=[
                pl.BlockSpec((rblk, cblk), lambda p, i, j, rpc=rpc: (p * rpc + i, j)),
                pl.BlockSpec((1, cblk), lambda p, i, j: (0, j)),
            ],
            out_specs=pl.BlockSpec((1, 1, _LANE), lambda p, i, j: (p, 0, 0)),
            scratch_shapes=[pltpu.VMEM((8, cblk), jnp.float32)],
        ),
        compiler_params=pltpu.CompilerParams(
            dimension_semantics=("parallel", "arbitrary", "arbitrary"),
            vmem_limit_bytes=_VMEM_LIMIT,
        ),
        cost_estimate=pl.CostEstimate(
            flops=4 * rows * cols,
            transcendentals=0,
            bytes_accessed=rows_p * cols * itemsize + cols * 4 + nchunk * _LANE * 4,
        ),
    )(x2, mask)

    # Each chunk's scaled partial lives in lane 0 of its output block.
    return jnp.sum(out[:, 0, 0])


def _reference(x, weight=1.0):
    """Pure-JAX reference of TV_x_Loss.forward (NCHW, same as PyTorch)."""
    n, c, h, w = x.shape
    count_w = c * h * (w - 1)
    w_tv = jnp.sum((x[:, :, :, 1:] - x[:, :, :, :-1]) ** 2)
    return weight * 2.0 * (w_tv / count_w) / n


if __name__ == "__main__":
    key = jax.random.PRNGKey(0)

    # Main test shape (matches the module's typical NCHW usage).
    x = jax.random.normal(key, (2, 4, 16, 16), jnp.float32)
    out = jax.block_until_ready(tv_x_loss_pallas(x))
    ref = _reference(x)
    assert out.shape == ()
    assert jnp.allclose(out, ref, atol=1e-5, rtol=1e-5), f"mismatch: pallas={out} ref={ref}"

    # Second shape exercises the row-padding path (N*C not a multiple of 8).
    x2 = jax.random.normal(jax.random.PRNGKey(0), (2, 3, 16, 16), jnp.float32)
    out2 = jax.block_until_ready(tv_x_loss_pallas(x2))
    ref2 = _reference(x2)
    assert jnp.allclose(out2, ref2, atol=1e-5, rtol=1e-5), f"mismatch: pallas={out2} ref={ref2}"

    print("KERNEL_OK")
</pallas_src>

<mosaic_0001>
module attributes {stable_mosaic.version = 11 : i64} {
  func.func @_tv_x_kernel(%arg0: i32, %arg1: i32, %arg2: i32, %arg3: memref<8x256xf32, #tpu.memory_space<vmem>>, %arg4: memref<1x256xf32, #tpu.memory_space<vmem>>, %arg5: memref<1x1x128xf32, #tpu.memory_space<vmem>>, %arg6: memref<8x256xf32, #tpu.memory_space<vmem>>) attributes {dimension_semantics = [#tpu.dimension_semantics<parallel>, #tpu.dimension_semantics<arbitrary>, #tpu.dimension_semantics<arbitrary>], iteration_bounds = array<i64: 1, 1, 1>, scalar_prefetch = 0 : i64, scratch_operands = 1 : i64, tpu.core_type = #tpu.core_type<tc>, window_params = [{transform_indices = @transform_0, window_bounds = array<i64: 8, 256>}, {transform_indices = @transform_1, window_bounds = array<i64: 1, 256>}, {transform_indices = @transform_2, window_bounds = array<i64: 1, 1, 128>}]} {
    %c0_i32 = arith.constant 0 : i32
    %0 = arith.cmpi eq, %arg1, %c0_i32 : i32
    %c0_i32_0 = arith.constant 0 : i32
    %1 = arith.cmpi eq, %arg2, %c0_i32_0 : i32
    %2 = arith.andi %0, %1 : i1
    %3 = arith.extui %2 : i1 to i32
    %c0_i32_1 = arith.constant 0 : i32
    %4 = arith.cmpi ne, %3, %c0_i32_1 : i32
    scf.if %4 {
      %cst_12 = arith.constant 0.000000e+00 : f32
      %22 = vector.broadcast %cst_12 : f32 to vector<8x256xf32>
      %c0_13 = arith.constant 0 : index
      %c0_14 = arith.constant 0 : index
      %23 = vector.load %arg6[%c0_13, %c0_14] : memref<8x256xf32, #tpu.memory_space<vmem>>, vector<8x256xf32>
      tpu.vector_store %arg6[%c0_13, %c0_14], %22 {strides = array<i32>} : memref<8x256xf32, #tpu.memory_space<vmem>>, vector<8x256xf32>,
    } else {
    }
    %c0 = arith.constant 0 : index
    %c0_2 = arith.constant 0 : index
    %5 = vector.load %arg3[%c0, %c0_2] : memref<8x256xf32, #tpu.memory_space<vmem>>, vector<8x256xf32>
    %c255_i32 = arith.constant 255 : i32
    %6 = tpu.dynamic_rotate %5 by %c255_i32 dim 1 : vector<8x256xf32>, i32 -> vector<8x256xf32>
    %7 = arith.subf %6, %5 : vector<8x256xf32>
    %c0_3 = arith.constant 0 : index
    %c0_4 = arith.constant 0 : index
    %8 = vector.load %arg4[%c0_3, %c0_4] : memref<1x256xf32, #tpu.memory_space<vmem>>, vector<1x256xf32>
    %9 = vector.broadcast %8 : vector<1x256xf32> to vector<8x256xf32>
    %10 = arith.mulf %7, %9 : vector<8x256xf32>
    %11 = arith.mulf %10, %10 : vector<8x256xf32>
    %c0_5 = arith.constant 0 : index
    %c0_6 = arith.constant 0 : index
    %12 = vector.load %arg6[%c0_5, %c0_6] : memref<8x256xf32, #tpu.memory_space<vmem>>, vector<8x256xf32>
    %13 = vector.shape_cast %11 : vector<8x256xf32> to vector<1x8x256xf32>
    %cst = arith.constant dense<0.000000e+00> : vector<8x256xf32>
    %14 = vector.multi_reduction <add>, %13, %cst [0] : vector<1x8x256xf32> to vector<8x256xf32>
    %15 = arith.addf %12, %14 : vector<8x256xf32>
    %c0_7 = arith.constant 0 : index
    %c0_8 = arith.constant 0 : index
    %16 = vector.load %arg6[%c0_7, %c0_8] : memref<8x256xf32, #tpu.memory_space<vmem>>, vector<8x256xf32>
    tpu.vector_store %arg6[%c0_7, %c0_8], %15 {strides = array<i32>} : memref<8x256xf32, #tpu.memory_space<vmem>>, vector<8x256xf32>,
    %c0_i32_9 = arith.constant 0 : i32
    %17 = arith.cmpi eq, %arg1, %c0_i32_9 : i32
    %c0_i32_10 = arith.constant 0 : i32
    %18 = arith.cmpi eq, %arg2, %c0_i32_10 : i32
    %19 = arith.andi %17, %18 : i1
    %20 = arith.extui %19 : i1 to i32
    %c0_i32_11 = arith.constant 0 : i32
    %21 = arith.cmpi ne, %20, %c0_i32_11 : i32
    scf.if %21 {
      %c0_12 = arith.constant 0 : index
      %c0_13 = arith.constant 0 : index
      %22 = vector.load %arg6[%c0_12, %c0_13] : memref<8x256xf32, #tpu.memory_space<vmem>>, vector<8x256xf32>
      %23 = vector.shape_cast %22 : vector<8x256xf32> to vector<1x8x256xf32>
      %cst_14 = arith.constant dense<0.000000e+00> : vector<1xf32>
      %24 = vector.multi_reduction <add>, %23, %cst_14 [1, 2] : vector<1x8x256xf32> to vector<1xf32>
      %25 = vector.shape_cast %24 : vector<1xf32> to vector<1x1x1xf32>
      %26 = vector.extract %25[0, 0, 0] : f32 from vector<1x1x1xf32>
      %27 = vector.broadcast %26 : f32 to vector<1x1xf32>
      %cst_15 = arith.constant 0.00104166672 : f32
      %28 = vector.broadcast %cst_15 : f32 to vector<1x1xf32>
      %29 = arith.mulf %27, %28 : vector<1x1xf32>
      %30 = vector.shape_cast %29 : vector<1x1xf32> to vector<1x1x1xf32>
      %31 = vector.shape_cast %30 : vector<1x1x1xf32> to vector<1x1x1xf32>
      %32 = vector.broadcast %31 : vector<1x1x1xf32> to vector<1x1x128xf32>
      %c0_16 = arith.constant 0 : index
      %c0_17 = arith.constant 0 : index
      %c0_18 = arith.constant 0 : index
      %33 = vector.load %arg5[%c0_16, %c0_17, %c0_18] : memref<1x1x128xf32, #tpu.memory_space<vmem>>, vector<1x1x128xf32>
      tpu.vector_store %arg5[%c0_16, %c0_17, %c0_18], %32 {strides = array<i32>} : memref<1x1x128xf32, #tpu.memory_space<vmem>>, vector<1x1x128xf32>,
    } else {
    }
    return
  }
  func.func @transform_0(%arg0: i32, %arg1: i32, %arg2: i32) -> (i32, i32) {
    %c1_i32 = arith.constant 1 : i32
    %0 = arith.muli %arg0, %c1_i32 : i32
    %1 = arith.addi %0, %arg1 : i32
    %c0_i32 = arith.constant 0 : i32
    return %1, %arg2 : i32, i32
  }
  func.func @transform_1(%arg0: i32, %arg1: i32, %arg2: i32) -> (i32, i32) {
    %c0_i32 = arith.constant 0 : i32
    %c0_i32_0 = arith.constant 0 : i32
    return %c0_i32, %arg2 : i32, i32
  }
  func.func @transform_2(%arg0: i32, %arg1: i32, %arg2: i32) -> (i32, i32, i32) {
    %c0_i32 = arith.constant 0 : i32
    %c0_i32_0 = arith.constant 0 : i32
    %c0_i32_1 = arith.constant 0 : i32
    return %arg0, %c0_i32, %c0_i32_0 : i32, i32, i32
  }
}

</mosaic_0001>

<bundles_post_ra>
// kernel: tv_x_loss_pallas.1
= control target key start
LH: loop header
LB: loop body
LE: loop exit
PB: predicated region body
PF: predicated region fallthrough
CT: control target
= control target key end

     0   :  { %s169_s0 = inlined_call_operand.vmem [shape: f32[8,256], index: 0, kind: input, shape index: {}]   ;;  %s170_s1 = inlined_call_operand.vmem [shape: f32[1,256], index: 1, kind: input, shape index: {}]   ;;  %s171_s2 = inlined_call_operand.hbm [shape: f32[1,1,128], index: 2, kind: output, shape index: {}]  }
   0x1   :  { %v40_v0 = vld [vmem:[%s169_s0] sm:$0xff] }
   0x2   :  { %7 = vsyncpa [#allocation4], 0  ;;  %s140_s11 = smov 127   ;;  %v41_v1 = vld [vmem:[%s169_s0 + $0x8] sm:$0xff]  ;;  %v46_v2 = vlaneseq  ;;  %v53_v5 = vld [vmem:[%s170_s1] sm:$0x3] }
   0x3   :  { %42 = vrot.lane.b32.xlu0 %v40_v0, %s140_s11  ;;  %v55_v7 = vperm.slane %v53_v5, 0  ;;  %v56_v8 = vperm.slane %v53_v5, 1  ;;  %s141_s0 = smov [#allocation3]   ;;  %s95_s18 = sshll.u32 %s171_s2, 4  ;;  %s96_s18 = int_to_ptr.hbm [resolvable:$true] %s95_s18 }
   0x4   :  { %v47_v4 = vand.u32 127, %v46_v2  ;;  %s93_s1 = sshll.u32 %s141_s0, 4  ;;  %s94_s1 = int_to_ptr.vmem [resolvable:$true] %s93_s1 }
   0x6   :  { %vm48_vm0 = vcmp.lt.s32.totalorder %v47_v4, 127 }
   0xb   :  { %44 = vrot.lane.b32.xlu0 %v41_v1, %s140_s11 }
  0x75   :  { %v43_v3 = vpop.permute.xlu0 %42 }
  0x7d   :  { %v45_v6 = vpop.permute.xlu0 %44 }
  0x7e   :  { %v49_v9 = vsel %vm48_vm0, %v43_v3, %v45_v6  ;;  %v50_v10 = vsel %vm48_vm0, %v45_v6, %v43_v3 }
  0x7f   :  { %v51_v11 = vsub.f32 %v49_v9, %v40_v0  ;;  %v52_v12 = vsub.f32 %v50_v10, %v41_v1 }
  0x81   :  { %v59_v13 = vmul.f32 %v55_v7, %v51_v11  ;;  %v60_v14 = vmul.f32 %v56_v8, %v52_v12 }
  0x83   :  { %v61_v15 = vmul.f32 %v59_v13, %v59_v13  ;;  %v62_v16 = vmul.f32 %v60_v14, %v60_v14 }
  0x85   :  { %v75_v17 = vadd.f32 %v62_v16, %v61_v15 }
  0x87   :  { %76 = vadd.xlane.f32.xlu1 %v75_v17 }
  0xfa   :  { %v77_v18 = vpop.xlane.xlu1 %76 }
  0xfb   :  { %v78_v19 = vrot.slane %v77_v18, 4 }
  0xfd   :  { %v79_v20 = vadd.f32 %v78_v19, %v77_v18 }
  0xff   :  { %v80_v21 = vrot.slane %v79_v20, 2 }
 0x101   :  { %v81_v22 = vadd.f32 %v80_v21, %v79_v20 }
 0x103   :  { %v82_v23 = vrot.slane %v81_v22, 1 }
 0x105   :  { %v83_v24 = vadd.f32 %v82_v23, %v81_v22 }
 0x107   :  { %110 = vpush %v83_v24 }
 0x138   :  { %s111_s19 = spop %110 }
 0x139   :  { %v85_v25 = vstv %s111_s19 }
 0x13a   :  { %v86_v26 = vmul.f32 0.0010416667, %v85_v25 }
 0x13c   :  { %87 = vst [vmem:[#allocation3] sm:$0x1] %v86_v26 }
 0x13d   :  { %98 = dma.vmem_to_hbm [thread:$0]  %s94_s1, 16, %s96_s18, [#allocation4]  }
 0x13e   :  { %138 = dma.done.wait [#allocation4], 16  }
 0x13f   :  { %139 = vsyncadd [#allocation4], 4294967280 }
 0x140   :  { %103 = vsyncpa [#allocation4], 1 }

</bundles_post_ra>
